<compile_context>
chip_gen: v5e
topology: v5e:2x2
jax: 0.10.0
libtpu: 0.0.40
codegen_flags: <defaults>
</compile_context>

<pallas_src>
import jax
import jax.numpy as jnp
from jax.experimental import pallas as pl
from jax.experimental.pallas import tpu as pltpu


def _h_sigmoid_kernel(x_ref, o_ref):
    x = x_ref[...]
    # h_sigmoid(x) = ReLU6(x + 3) / 6.  Python scalars are weak-typed, so the
    # computation stays in the input dtype (matches torch's in-dtype math);
    # true division by 6 matches torch's `/ 6` semantics.
    o_ref[...] = (jnp.clip(x + 3.0, 0.0, 6.0) / 6.0).astype(o_ref.dtype)


def h_sigmoid(x: jax.Array, *, target_block_bytes: int = 4 * 1024 * 1024) -> jax.Array:
    """Elementwise hard-sigmoid matching torch's ReLU6(x+3)/6 semantics."""
    orig_shape = x.shape
    dtype = x.dtype
    total = x.size
    if total == 0:
        return x
    itemsize = jnp.dtype(dtype).itemsize

    # ---- lane-dense 2D slab (rows, lanes) ----------------------------------
    # Widest last dim (multiple of 128) that divides the element count; rows
    # need NOT be a multiple of 8 — Pallas masks the partial last block.
    lanes = None
    for cand in (2048, 1024, 512, 256, 128):
        if total % cand == 0:
            lanes = cand
            break
    if lanes is None:
        # Ragged element count (< multiple of 128).  A fused XLA elementwise op
        # is already one HBM read + one write; a Pallas prefix + tail + concat
        # would add a full extra pass, so don't.
        return jnp.clip(x + 3.0, 0.0, 6.0) / 6.0

    rows = total // lanes
    x2d = x.reshape(rows, lanes)

    # ---- block sizing ------------------------------------------------------
    # dtype-aware sublane multiple: 8 rows/vreg for 32-bit, 16 for 16-bit,
    # 32 for 8-bit, keeping block edges on unmasked vld/vst boundaries.
    sub = max(8, 32 // itemsize)

    tile_rows = max(sub, (target_block_bytes // (lanes * itemsize)) // sub * sub)
    if rows > sub:
        # Keep grid >= 2 so the v7x megacore (2 TensorCores) can split the
        # parallel axis; costs at most one extra ~0.35 us step on 1-TC chips.
        half_rows = ((rows + 1) // 2 + sub - 1) // sub * sub
        tile_rows = min(tile_rows, half_rows)
    tile_rows = min(tile_rows, rows)

    grid = (pl.cdiv(rows, tile_rows),)

    # Explicit scoped-VMEM limit: in + out, double-buffered, plus headroom;
    # capped well under v7x's 64 MiB physical VMEM per TensorCore.
    block_bytes = tile_rows * lanes * itemsize
    vmem_limit = int(min(48 << 20, max(32 << 20, 4 * block_bytes + (4 << 20))))

    out2d = pl.pallas_call(
        _h_sigmoid_kernel,
        out_shape=jax.ShapeDtypeStruct((rows, lanes), dtype),
        grid_spec=pltpu.PrefetchScalarGridSpec(
            num_scalar_prefetch=0,
            grid=grid,
            in_specs=[pl.BlockSpec((tile_rows, lanes), lambda i: (i, 0))],
            out_specs=pl.BlockSpec((tile_rows, lanes), lambda i: (i, 0)),
        ),
        compiler_params=pltpu.CompilerParams(
            dimension_semantics=("parallel",),
            vmem_limit_bytes=vmem_limit,
        ),
        cost_estimate=pl.CostEstimate(
            flops=3 * total,
            transcendentals=0,
            bytes_accessed=2 * total * itemsize,
        ),
    )(x2d)

    return out2d.reshape(orig_shape)


if __name__ == "__main__":
    key = jax.random.PRNGKey(0)
    # NCHW input, matching PyTorch conv-style layout conventions.
    x = jax.random.normal(key, (2, 4, 16, 16), dtype=jnp.float32) * 4.0

    y = h_sigmoid(x)
    jax.block_until_ready(y)

    # Reference check against pure-JAX semantics of ReLU6(x+3)/6.
    y_ref = jnp.clip(x + 3.0, 0.0, 6.0) / 6.0
    assert y.shape == x.shape and y.dtype == x.dtype
    assert jnp.max(jnp.abs(y - y_ref)) < 1e-6

    print("KERNEL_OK")
</pallas_src>

<mosaic_0001>
module attributes {stable_mosaic.version = 11 : i64} {
  func.func @_h_sigmoid_kernel(%arg0: i32, %arg1: memref<1x2048xf32, #tpu.memory_space<vmem>>, %arg2: memref<1x2048xf32, #tpu.memory_space<vmem>>) attributes {dimension_semantics = [#tpu.dimension_semantics<parallel>], iteration_bounds = array<i64: 1>, scalar_prefetch = 0 : i64, scratch_operands = 0 : i64, tpu.core_type = #tpu.core_type<tc>, window_params = [{transform_indices = @transform_0, window_bounds = array<i64: 1, 2048>}, {transform_indices = @transform_1, window_bounds = array<i64: 1, 2048>}]} {
    %c0 = arith.constant 0 : index
    %c0_0 = arith.constant 0 : index
    %0 = vector.load %arg1[%c0, %c0_0] : memref<1x2048xf32, #tpu.memory_space<vmem>>, vector<1x2048xf32>
    %cst = arith.constant 3.000000e+00 : f32
    %1 = vector.broadcast %cst : f32 to vector<1x2048xf32>
    %2 = arith.addf %0, %1 : vector<1x2048xf32>
    %cst_1 = arith.constant 0.000000e+00 : f32
    %cst_2 = arith.constant 6.000000e+00 : f32
    %3 = vector.broadcast %cst_1 : f32 to vector<1x2048xf32>
    %4 = arith.maximumf %3, %2 : vector<1x2048xf32>
    %5 = vector.broadcast %cst_2 : f32 to vector<1x2048xf32>
    %6 = arith.minimumf %5, %4 : vector<1x2048xf32>
    %cst_3 = arith.constant 6.000000e+00 : f32
    %7 = vector.broadcast %cst_3 : f32 to vector<1x2048xf32>
    %8 = arith.divf %6, %7 : vector<1x2048xf32>
    %c0_4 = arith.constant 0 : index
    %c0_5 = arith.constant 0 : index
    %9 = vector.load %arg2[%c0_4, %c0_5] : memref<1x2048xf32, #tpu.memory_space<vmem>>, vector<1x2048xf32>
    tpu.vector_store %arg2[%c0_4, %c0_5], %8 {strides = array<i32>} : memref<1x2048xf32, #tpu.memory_space<vmem>>, vector<1x2048xf32>,
    return
  }
  func.func @transform_0(%arg0: i32) -> (i32, i32) {
    %c0_i32 = arith.constant 0 : i32
    %c0_i32_0 = arith.constant 0 : i32
    return %arg0, %c0_i32 : i32, i32
  }
  func.func @transform_1(%arg0: i32) -> (i32, i32) {
    %c0_i32 = arith.constant 0 : i32
    %c0_i32_0 = arith.constant 0 : i32
    return %arg0, %c0_i32 : i32, i32
  }
}

</mosaic_0001>

<bundles_post_ra>
// kernel: tpu_custom_call.1
= control target key start
LH: loop header
LB: loop body
LE: loop exit
PB: predicated region body
PF: predicated region fallthrough
CT: control target
= control target key end

     0   :  { %6 = vsyncpa [#allocation3], 0  ;;  %s135_s0 = inlined_call_operand.hbm [shape: f32[1,2048], index: 0, kind: input, shape index: {}]   ;;  %s136_s1 = inlined_call_operand.hbm [shape: f32[1,2048], index: 1, kind: output, shape index: {}]  }
   0x1   :  { %7 = vsyncpa [#allocation4], 0  ;;  %s13_s8 = sshll.u32 %s135_s0, 4  ;;  %s116_s9 = smov [#allocation2]   ;;  %s14_s8 = int_to_ptr.hbm [resolvable:$true] %s13_s8 }
   0x2   :  { %s15_s10 = sshll.u32 %s116_s9, 4  ;;  %s16_s10 = int_to_ptr.vmem [resolvable:$true] %s15_s10 }
   0x3   :  { %18 = dma.hbm_to_vmem [thread:$0]  %s14_s8, 256, %s16_s10, [#allocation3]  }
   0x4   :  { %112 = dma.done.wait [#allocation3], 256  }
   0x5   :  { %113 = vsyncadd [#allocation3], 4294967040  ;;  %v117_v0 = vmov 6.0   ;;  %v23_v2 = vld [vmem:[#allocation2] sm:$0xff]  ;;  %v24_v3 = vld [vmem:[#allocation2 + $0x8] sm:$0xff]  ;;  %s118_s0 = smov [#allocation5]  }
   0x6   :  { %62 = vrcp.f32 %v117_v0  ;;  %v25_v4 = vadd.f32 3.0, %v23_v2  ;;  %v26_v6 = vadd.f32 3.0, %v24_v3  ;;  %s47_s11 = sshll.u32 %s118_s0, 4  ;;  %s49_s14 = sshll.u32 %s136_s1, 4  ;;  %s48_s11 = int_to_ptr.vmem [resolvable:$true] %s47_s11  ;;  %s50_s14 = int_to_ptr.hbm [resolvable:$true] %s49_s14 }
   0x8   :  { %v27_v7 = vmax.f32 %v25_v4, 0.0  ;;  %v28_v9 = vmax.f32 %v26_v6, 0.0 }
   0xa   :  { %v29_v11 = vmin.f32 %v27_v7, 6.0  ;;  %v30_v12 = vmin.f32 %v28_v9, 6.0 }
   0xc   :  { %v63_v1 = vpop.eup %62 }
   0xd   :  { %v32_v5 = vmul.f32 6.0, %v63_v1  ;;  %vm36_vm0 = vweird.f32 %v63_v1 }
   0xf   :  { %v33_v8 = vsub.f32 1.0, %v32_v5 }
  0x11   :  { %v34_v10 = vmul.f32 %v63_v1, %v33_v8 }
  0x13   :  { %v35_v13 = vadd.f32 %v63_v1, %v34_v10 }
  0x15   :  { %v37_v14 = vsel %vm36_vm0, %v63_v1, %v35_v13 }
  0x16   :  { %v38_v15 = vmul.f32 %v37_v14, %v29_v11  ;;  %v39_v16 = vmul.f32 %v37_v14, %v30_v12 }
  0x18   :  { %40 = vst [vmem:[#allocation5] sm:$0xff] %v38_v15 }
  0x19   :  { %41 = vst [vmem:[#allocation5 + $0x8] sm:$0xff] %v39_v16 }
  0x1a   :  { %52 = dma.vmem_to_hbm [thread:$0]  %s48_s11, 256, %s50_s14, [#allocation4]  }
  0x1b   :  { %114 = dma.done.wait [#allocation4], 256  }
  0x1c   :  { %115 = vsyncadd [#allocation4], 4294967040 }
  0x1d   :  { %57 = vsyncpa [#allocation3], 1 }
  0x1e   :  { %58 = vsyncpa [#allocation4], 1 }

</bundles_post_ra>
